<compile_context>
chip_gen: v5e
topology: v5e:2x2
jax: 0.10.0
libtpu: 0.0.40
codegen_flags: <defaults>
</compile_context>

<pallas_src>
import functools

import jax
import jax.numpy as jnp
from jax import lax
from jax.experimental import pallas as pl
from jax.experimental.pallas import tpu as pltpu

# Large finite negative (avoids -inf edge cases in the online logsumexp).
_MASK_VALUE = -1e30


def _infonce_kernel(zr_ref, zc_ref, zp_ref, out_ref, m_ref, l_ref, s_ref,
                    *, inv_temp):
    i = pl.program_id(0)   # row block
    j = pl.program_id(1)   # col block (reduction axis)

    @pl.when(j == 0)
    def _init():
        m_ref[...] = jnp.full_like(m_ref, _MASK_VALUE)
        l_ref[...] = jnp.zeros_like(l_ref)

    # Fold 1/T into the row tile (weak-typed scalar keeps the input dtype, so
    # bf16 inputs stay bf16 into the MXU).
    zr_s = zr_ref[...] * inv_temp

    # (TM, TN) similarity tile: contract on the feature dim of both operands —
    # no transpose of the column tile is ever materialized.
    s_ref[...] = lax.dot_general(
        zr_s, zc_ref[...],
        dimension_numbers=(((1,), (1,)), ((), ())),
        preferred_element_type=jnp.float32,
    )

    # Self-similarity mask: only diagonal tiles (i == j, square tiles) touch the
    # diagonal, so only they pay for the iota/compare/select.
    @pl.when(i == j)
    def _mask_diag():
        r = lax.broadcasted_iota(jnp.int32, s_ref.shape, 0)
        c = lax.broadcasted_iota(jnp.int32, s_ref.shape, 1)
        s_ref[...] = jnp.where(r == c, _MASK_VALUE, s_ref[...])

    # Online (flash-style) logsumexp update over column blocks.
    s = s_ref[...]
    m_prev = m_ref[...]
    m_new = jnp.maximum(m_prev, jnp.max(s, axis=1, keepdims=True))
    alpha = jnp.exp(m_prev - m_new)
    p = jnp.exp(s - m_new)
    l_ref[...] = l_ref[...] * alpha + jnp.sum(p, axis=1, keepdims=True)
    m_ref[...] = m_new

    @pl.when(j == pl.num_programs(1) - 1)
    def _finalize():
        lse = m_ref[...] + jnp.log(l_ref[...])
        # Positive term: pos_i = (z_i . z_{partner(i)}) / T ; zr_s already
        # carries the 1/T factor.  O(TM * D) once per row block.
        pos = jnp.sum(
            zr_s.astype(jnp.float32) * zp_ref[...].astype(jnp.float32),
            axis=1, keepdims=True)
        out_ref[...] = lse - pos


def _pick_block(batch_size):
    """Largest MXU-friendly tile (multiple of 8, <= 512) dividing batch_size."""
    for cand in (512, 256, 128, 64, 32, 16, 8):
        if batch_size % cand == 0:
            return cand
    raise ValueError(
        "batch_size must be a multiple of 8 for the tiled InfoNCE kernel "
        f"(got {batch_size})")


def infonce_loss(z, batch_size, temperature, block=None):
    N, D = z.shape
    assert N == 2 * batch_size, "z must have 2*batch_size rows"
    if block is None:
        block = _pick_block(batch_size)
    tm = tn = block                      # square tiles (diag mask assumes this)
    nb = N // tm                         # number of row/col blocks
    nbh = batch_size // tm               # half-offset in blocks -> partner block
    inv_temp = 1.0 / float(temperature)

    grid = (N // tm, N // tn)

    kernel = functools.partial(_infonce_kernel, inv_temp=inv_temp)

    # Advisory cost estimate for the XLA scheduler.
    cost = pl.CostEstimate(
        flops=2 * N * N * D,
        transcendentals=N * N,
        bytes_accessed=int(N * D * z.dtype.itemsize * (grid[1] + 2) + N * 4),
    )

    # Raise the scoped VMEM limit enough for MXU-sized (double-buffered) tiles,
    # staying well under the smallest physical VMEM (64 MiB on v7x).
    itemsize = z.dtype.itemsize
    vmem_need = (2 * (tm + tn + tm) * D * itemsize    # double-buffered z tiles
                 + (tm * tn + 2 * tm) * 4             # s / m / l scratch
                 + 2 * tm * 4)                        # output tile
    vmem_limit = int(min(48 * 1024 * 1024, max(32 * 1024 * 1024, 2 * vmem_need)))

    per_row = pl.pallas_call(
        kernel,
        out_shape=jax.ShapeDtypeStruct((N, 1), jnp.float32),
        grid_spec=pltpu.PrefetchScalarGridSpec(
            num_scalar_prefetch=0,
            grid=grid,
            in_specs=[
                pl.BlockSpec((tm, D), lambda i, j: (i, 0)),                 # row tile
                pl.BlockSpec((tn, D), lambda i, j: (j, 0)),                 # col tile
                pl.BlockSpec((tm, D), lambda i, j: ((i + nbh) % nb, 0)),    # partner rows
            ],
            out_specs=pl.BlockSpec((tm, 1), lambda i, j: (i, 0)),
            scratch_shapes=[
                pltpu.VMEM((tm, 1), jnp.float32),    # running max m
                pltpu.VMEM((tm, 1), jnp.float32),    # running sum l
                pltpu.VMEM((tm, tn), jnp.float32),   # similarity tile
            ],
        ),
        compiler_params=pltpu.CompilerParams(
            dimension_semantics=("parallel", "arbitrary"),
            vmem_limit_bytes=vmem_limit,
        ),
        cost_estimate=cost,
    )(z, z, z)

    # Tiny final reduction (N floats) stays in plain JAX so that row blocks can
    # be sharded across TensorCores without a cross-core scalar accumulator.
    return jnp.sum(per_row) / jnp.float32(N)


def _reference_loss(z, batch_size, temperature):
    """Pure-JAX reference mirroring the PyTorch module semantics."""
    z = z.astype(jnp.float32)
    N = 2 * batch_size
    sim = (z @ z.T) / temperature
    idx = jnp.arange(N)
    partner = jnp.where(idx < batch_size, idx + batch_size, idx - batch_size)
    pos = sim[idx, partner]
    sim_masked = jnp.where(jnp.eye(N, dtype=bool), -jnp.inf, sim)
    lse = jax.scipy.special.logsumexp(sim_masked, axis=1)
    return jnp.sum(lse - pos) / N


if __name__ == "__main__":
    batch_size = 8           # multiple of 8 -> 8x8 tiles, 2x2 block grid
    temperature = 0.5
    feature_dim = 32
    N = 2 * batch_size

    key = jax.random.PRNGKey(0)
    z = jax.random.normal(key, (N, feature_dim), dtype=jnp.float32)
    # Typical SimCLR usage L2-normalizes embeddings; keep it for realism.
    z = z / jnp.linalg.norm(z, axis=1, keepdims=True)

    loss = infonce_loss(z, batch_size, temperature)
    loss = jax.block_until_ready(loss)

    ref = _reference_loss(z, batch_size, temperature)
    assert jnp.allclose(loss, ref, rtol=1e-5, atol=1e-5), (loss, ref)

    print("KERNEL_OK")
</pallas_src>

<mosaic_0001>
module attributes {stable_mosaic.version = 11 : i64} {
  func.func @_infonce_kernel(%arg0: i32, %arg1: i32, %arg2: memref<8x32xf32, #tpu.memory_space<vmem>>, %arg3: memref<8x32xf32, #tpu.memory_space<vmem>>, %arg4: memref<8x32xf32, #tpu.memory_space<vmem>>, %arg5: memref<8x1xf32, #tpu.memory_space<vmem>>, %arg6: memref<8x1xf32, #tpu.memory_space<vmem>>, %arg7: memref<8x1xf32, #tpu.memory_space<vmem>>, %arg8: memref<8x8xf32, #tpu.memory_space<vmem>>) attributes {dimension_semantics = [#tpu.dimension_semantics<parallel>, #tpu.dimension_semantics<arbitrary>], iteration_bounds = array<i64: 2, 2>, scalar_prefetch = 0 : i64, scratch_operands = 3 : i64, tpu.core_type = #tpu.core_type<tc>, window_params = [{transform_indices = @transform_0, window_bounds = array<i64: 8, 32>}, {transform_indices = @transform_1, window_bounds = array<i64: 8, 32>}, {transform_indices = @transform_2, window_bounds = array<i64: 8, 32>}, {transform_indices = @transform_3, window_bounds = array<i64: 8, 1>}]} {
    %c0_i32 = arith.constant 0 : i32
    %0 = arith.cmpi eq, %arg1, %c0_i32 : i32
    %1 = arith.extui %0 : i1 to i32
    %c0_i32_0 = arith.constant 0 : i32
    %2 = arith.cmpi ne, %1, %c0_i32_0 : i32
    scf.if %2 {
      %cst_21 = arith.constant -1.000000e+30 : f32
      %32 = vector.broadcast %cst_21 : f32 to vector<8x1xf32>
      %c0_22 = arith.constant 0 : index
      %c0_23 = arith.constant 0 : index
      %33 = vector.load %arg6[%c0_22, %c0_23] : memref<8x1xf32, #tpu.memory_space<vmem>>, vector<8x1xf32>
      tpu.vector_store %arg6[%c0_22, %c0_23], %32 {strides = array<i32>} : memref<8x1xf32, #tpu.memory_space<vmem>>, vector<8x1xf32>,
      %cst_24 = arith.constant 0.000000e+00 : f32
      %34 = vector.broadcast %cst_24 : f32 to vector<8x1xf32>
      %c0_25 = arith.constant 0 : index
      %c0_26 = arith.constant 0 : index
      %35 = vector.load %arg7[%c0_25, %c0_26] : memref<8x1xf32, #tpu.memory_space<vmem>>, vector<8x1xf32>
      tpu.vector_store %arg7[%c0_25, %c0_26], %34 {strides = array<i32>} : memref<8x1xf32, #tpu.memory_space<vmem>>, vector<8x1xf32>,
    } else {
    }
    %c0 = arith.constant 0 : index
    %c0_1 = arith.constant 0 : index
    %3 = vector.load %arg2[%c0, %c0_1] : memref<8x32xf32, #tpu.memory_space<vmem>>, vector<8x32xf32>
    %cst = arith.constant 2.000000e+00 : f32
    %4 = vector.broadcast %cst : f32 to vector<8x32xf32>
    %5 = arith.mulf %3, %4 : vector<8x32xf32>
    %c0_2 = arith.constant 0 : index
    %c0_3 = arith.constant 0 : index
    %6 = vector.load %arg3[%c0_2, %c0_3] : memref<8x32xf32, #tpu.memory_space<vmem>>, vector<8x32xf32>
    %cst_4 = arith.constant dense<0.000000e+00> : vector<8x8xf32>
    %7 = tpu.matmul %5, %6, %cst_4 {dimension_numbers = #tpu.dot_dimension_numbers<[1], [1], [0], [0], [0, 0, 1, 0], [], []>} : vector<8x32xf32>, vector<8x32xf32>, vector<8x8xf32> -> vector<8x8xf32>
    %c0_5 = arith.constant 0 : index
    %c0_6 = arith.constant 0 : index
    %8 = vector.load %arg8[%c0_5, %c0_6] : memref<8x8xf32, #tpu.memory_space<vmem>>, vector<8x8xf32>
    tpu.vector_store %arg8[%c0_5, %c0_6], %7 {strides = array<i32>} : memref<8x8xf32, #tpu.memory_space<vmem>>, vector<8x8xf32>,
    %9 = arith.cmpi eq, %arg0, %arg1 : i32
    %10 = arith.extui %9 : i1 to i32
    %c0_i32_7 = arith.constant 0 : i32
    %11 = arith.cmpi ne, %10, %c0_i32_7 : i32
    scf.if %11 {
      %32 = tpu.iota {dimensions = array<i32: 0>} : vector<8x8xi32>
      %33 = tpu.iota {dimensions = array<i32: 1>} : vector<8x8xi32>
      %34 = arith.cmpi eq, %32, %33 : vector<8x8xi32>
      %c0_21 = arith.constant 0 : index
      %c0_22 = arith.constant 0 : index
      %35 = vector.load %arg8[%c0_21, %c0_22] : memref<8x8xf32, #tpu.memory_space<vmem>>, vector<8x8xf32>
      %cst_23 = arith.constant -1.000000e+30 : f32
      %36 = vector.broadcast %cst_23 : f32 to vector<8x8xf32>
      %37 = arith.select %34, %36, %35 : vector<8x8xi1>, vector<8x8xf32>
      %c0_24 = arith.constant 0 : index
      %c0_25 = arith.constant 0 : index
      %38 = vector.load %arg8[%c0_24, %c0_25] : memref<8x8xf32, #tpu.memory_space<vmem>>, vector<8x8xf32>
      tpu.vector_store %arg8[%c0_24, %c0_25], %37 {strides = array<i32>} : memref<8x8xf32, #tpu.memory_space<vmem>>, vector<8x8xf32>,
    } else {
    }
    %c0_8 = arith.constant 0 : index
    %c0_9 = arith.constant 0 : index
    %12 = vector.load %arg8[%c0_8, %c0_9] : memref<8x8xf32, #tpu.memory_space<vmem>>, vector<8x8xf32>
    %c0_10 = arith.constant 0 : index
    %c0_11 = arith.constant 0 : index
    %13 = vector.load %arg6[%c0_10, %c0_11] : memref<8x1xf32, #tpu.memory_space<vmem>>, vector<8x1xf32>
    %cst_12 = arith.constant dense<0xFF800000> : vector<8xf32>
    %14 = vector.multi_reduction <maximumf>, %12, %cst_12 [1] : vector<8x8xf32> to vector<8xf32>
    %15 = vector.shape_cast %14 : vector<8xf32> to vector<8x1xf32>
    %16 = arith.maximumf %13, %15 : vector<8x1xf32>
    %17 = arith.subf %13, %16 : vector<8x1xf32>
    %18 = math.exp %17 : vector<8x1xf32>
    %19 = vector.broadcast %16 : vector<8x1xf32> to vector<8x8xf32>
    %20 = arith.subf %12, %19 : vector<8x8xf32>
    %21 = math.exp %20 : vector<8x8xf32>
    %c0_13 = arith.constant 0 : index
    %c0_14 = arith.constant 0 : index
    %22 = vector.load %arg7[%c0_13, %c0_14] : memref<8x1xf32, #tpu.memory_space<vmem>>, vector<8x1xf32>
    %23 = arith.mulf %22, %18 : vector<8x1xf32>
    %cst_15 = arith.constant dense<0.000000e+00> : vector<8xf32>
    %24 = vector.multi_reduction <add>, %21, %cst_15 [1] : vector<8x8xf32> to vector<8xf32>
    %25 = vector.shape_cast %24 : vector<8xf32> to vector<8x1xf32>
    %26 = arith.addf %23, %25 : vector<8x1xf32>
    %c0_16 = arith.constant 0 : index
    %c0_17 = arith.constant 0 : index
    %27 = vector.load %arg7[%c0_16, %c0_17] : memref<8x1xf32, #tpu.memory_space<vmem>>, vector<8x1xf32>
    tpu.vector_store %arg7[%c0_16, %c0_17], %26 {strides = array<i32>} : memref<8x1xf32, #tpu.memory_space<vmem>>, vector<8x1xf32>,
    %c0_18 = arith.constant 0 : index
    %c0_19 = arith.constant 0 : index
    %28 = vector.load %arg6[%c0_18, %c0_19] : memref<8x1xf32, #tpu.memory_space<vmem>>, vector<8x1xf32>
    tpu.vector_store %arg6[%c0_18, %c0_19], %16 {strides = array<i32>} : memref<8x1xf32, #tpu.memory_space<vmem>>, vector<8x1xf32>,
    %c1_i32 = arith.constant 1 : i32
    %29 = arith.cmpi eq, %arg1, %c1_i32 : i32
    %30 = arith.extui %29 : i1 to i32
    %c0_i32_20 = arith.constant 0 : i32
    %31 = arith.cmpi ne, %30, %c0_i32_20 : i32
    scf.if %31 {
      %c0_21 = arith.constant 0 : index
      %c0_22 = arith.constant 0 : index
      %32 = vector.load %arg6[%c0_21, %c0_22] : memref<8x1xf32, #tpu.memory_space<vmem>>, vector<8x1xf32>
      %c0_23 = arith.constant 0 : index
      %c0_24 = arith.constant 0 : index
      %33 = vector.load %arg7[%c0_23, %c0_24] : memref<8x1xf32, #tpu.memory_space<vmem>>, vector<8x1xf32>
      %34 = math.log %33 : vector<8x1xf32>
      %35 = arith.addf %32, %34 : vector<8x1xf32>
      %c0_25 = arith.constant 0 : index
      %c0_26 = arith.constant 0 : index
      %36 = vector.load %arg4[%c0_25, %c0_26] : memref<8x32xf32, #tpu.memory_space<vmem>>, vector<8x32xf32>
      %37 = arith.mulf %5, %36 : vector<8x32xf32>
      %cst_27 = arith.constant dense<0.000000e+00> : vector<8xf32>
      %38 = vector.multi_reduction <add>, %37, %cst_27 [1] : vector<8x32xf32> to vector<8xf32>
      %39 = vector.shape_cast %38 : vector<8xf32> to vector<8x1xf32>
      %40 = arith.subf %35, %39 : vector<8x1xf32>
      %c0_28 = arith.constant 0 : index
      %c0_29 = arith.constant 0 : index
      %41 = vector.load %arg5[%c0_28, %c0_29] : memref<8x1xf32, #tpu.memory_space<vmem>>, vector<8x1xf32>
      tpu.vector_store %arg5[%c0_28, %c0_29], %40 {strides = array<i32>} : memref<8x1xf32, #tpu.memory_space<vmem>>, vector<8x1xf32>,
    } else {
    }
    return
  }
  func.func @transform_0(%arg0: i32, %arg1: i32) -> (i32, i32) {
    %c0_i32 = arith.constant 0 : i32
    %c0_i32_0 = arith.constant 0 : i32
    return %arg0, %c0_i32 : i32, i32
  }
  func.func @transform_1(%arg0: i32, %arg1: i32) -> (i32, i32) {
    %c0_i32 = arith.constant 0 : i32
    %c0_i32_0 = arith.constant 0 : i32
    return %arg1, %c0_i32 : i32, i32
  }
  func.func @transform_2(%arg0: i32, %arg1: i32) -> (i32, i32) {
    %c1_i32 = arith.constant 1 : i32
    %0 = arith.addi %arg0, %c1_i32 : i32
    %c2_i32 = arith.constant 2 : i32
    %c0_i32 = arith.constant 0 : i32
    %1 = arith.cmpi eq, %c2_i32, %c0_i32 : i32
    %c1_i32_0 = arith.constant 1 : i32
    %2 = arith.select %1, %c1_i32_0, %c2_i32 : i32
    %3 = arith.remsi %0, %2 : i32
    %c0_i32_1 = arith.constant 0 : i32
    %4 = arith.cmpi ne, %3, %c0_i32_1 : i32
    %c0_i32_2 = arith.constant 0 : i32
    %5 = arith.cmpi slt, %3, %c0_i32_2 : i32
    %c0_i32_3 = arith.constant 0 : i32
    %6 = arith.cmpi slt, %2, %c0_i32_3 : i32
    %7 = arith.xori %5, %6 : i1
    %8 = arith.andi %7, %4 : i1
    %9 = arith.addi %3, %2 : i32
    %10 = arith.select %8, %9, %3 : i32
    %c0_i32_4 = arith.constant 0 : i32
    %c0_i32_5 = arith.constant 0 : i32
    return %10, %c0_i32_4 : i32, i32
  }
  func.func @transform_3(%arg0: i32, %arg1: i32) -> (i32, i32) {
    %c0_i32 = arith.constant 0 : i32
    %c0_i32_0 = arith.constant 0 : i32
    return %arg0, %c0_i32 : i32, i32
  }
}

</mosaic_0001>

<bundles_post_ra>
// kernel: tpu_custom_call.1
= control target key start
LH: loop header
LB: loop body
LE: loop exit
PB: predicated region body
PF: predicated region fallthrough
CT: control target
= control target key end

     0   :  { %s1255_s0 = inlined_call_operand.hbm [shape: f32[16,32], index: 0, kind: input, shape index: {}]   ;;  %s1256_s1 = inlined_call_operand.hbm [shape: f32[16,32], index: 1, kind: input, shape index: {}]   ;;  %s1257_s2 = inlined_call_operand.hbm [shape: f32[16,32], index: 2, kind: input, shape index: {}]   ;;  %s1258_s3 = inlined_call_operand.vmem [shape: f32[16,1], index: 3, kind: output, shape index: {}]  }
   0x1   :  { %1269 = sst [smem:[#allocation22_spill]] %s1256_s1 }
   0x2   :  { %1270 = sst [smem:[#allocation23_spill]] %s1258_s3 }
   0x3   :  { %8 = vsyncpa [#allocation6], 0 }
   0x4   :  { %10 = vsyncpa [#allocation6 + $0x1], 0 }
   0x5   :  { %11 = vsyncpa [#allocation8], 0 }
   0x6   :  { %13 = vsyncpa [#allocation8 + $0x1], 0  ;;  %s946_s12 = smov 0   ;;  %s948_s13 = smov 0  }
   0x7   :  { %s950_s14 = smov 0   ;;  %s952_s15 = smov 0  }
   0x8   :  { %s954_s16 = smov 0   ;;  %s956_s17 = smov 0  }
   0x9   :  { %s958_s18 = smov 0   ;;  %s960_s19 = smov 0  }
   0xa   :  { %s962_s20 = smov 0   ;;  %s964_s21 = smov 0  }
   0xb   :  { %s966_s22 = smov 0   ;;  %s968_s23 = smov 0  }
   0xc   :  { %s970_s24 = smov 0   ;;  %s972_s25 = smov 0  }
   0xd LB: > { %1271 = sst [smem:[#allocation13_spill]] %s885_s16  ;;  %s1259_s26 = sadd.s32 4294967295, %s921_s25   ;;  %s921_s25 = sphi %s972_s25, %s19_s25   ;;  %s917_s24 = sphi %s970_s24, %s1314_s24   ;;  %s913_s23 = sphi %s968_s23, %s1306_s23   ;;  %s909_s22 = sphi %s966_s22, %s1313_s22   ;;  %s905_s21 = sphi %s964_s21, %s1305_s21   ;;  %s901_s20 = sphi %s962_s20, %s1312_s20   ;;  %s897_s19 = sphi %s960_s19, %s1311_s19   ;;  %s893_s18 = sphi %s958_s18, %s1310_s18   ;;  %s889_s17 = sphi %s956_s17, %s1304_s17   ;;  %s885_s16 = sphi %s954_s16, %s1303_s16   ;;  %s881_s15 = sphi %s952_s15, %s1302_s15   ;;  %s877_s14 = sphi %s950_s14, %s1309_s14   ;;  %s873_s13 = sphi %s948_s13, %s1308_s13   ;;  %s869_s12 = sphi %s946_s12, %s1307_s12  }
   0xe   : > { %1272 = sst [smem:[#allocation14_spill]] %s889_s17  ;;  %s28_s27 = sadd.s32 1, %s913_s23 }
   0xf   : > { %1273 = sst [smem:[#allocation15_spill]] %s905_s21  ;;  %p1016_p0 = scmp.ge.s32.totalorder %s28_s27, 2 }
  0x10   : > { %1274 = sst [smem:[#allocation16_spill]] %s909_s22  ;;  %p46_p1 = scmp.eq.s32.totalorder %s921_s25, 0 }
  0x11   : > { %1275 = sst [smem:[#allocation17_spill]] %s913_s23  ;;  %p1023_p2 = scmp.eq.s32.totalorder %s1259_s26, 0 }
  0x12   : > { %s64_s30 = sadd.s32 1, %s889_s17  ;;  %s1316_s27 = smov (%p1016_p0, %s28_s27), 0 }
  0x13   : > { %1278 = sst [smem:[#allocation18_spill]] %s1316_s27  ;;  %p71_p3 = scmp.ne.s32.totalorder %s889_s17, %s885_s16 }
  0x14   : > { %p77_p4 = scmp.ne.s32.totalorder %s885_s16, %s881_s15  ;;  %s61_s4 = ssub.s32 %s913_s23, %s1316_s27 }
  0x15   : > { %p62_p5 = scmp.eq.s32.totalorder %s61_s4, 0  ;;  %p1039_p6 = por %p71_p3, %p46_p1 }
  0x16   : > { %p1045_p7 = por %p77_p4, %p1023_p2  ;;  %p586_p8 = scmp.lt.s32.totalorder %s921_s25, 4 }
  0x17   : > { %s1051_s7 = scalar_select %p62_p5, %s889_s17, %s64_s30  }
  0x18   : > { %s1280_s6 = scalar_select %p1045_p7, 1, 0 }
  0x19   : > { %1282 = sst [smem:[#allocation20_spill]] %s1051_s7  ;;  %s198_s8 = sand.u32 1, %s921_s25  }
  0x1a   : > { %1281 = sst [smem:[#allocation19_spill]] %s1280_s6  ;;  %s200_s9 = sand.u32 1, %s889_s17  }
  0x1b   : > { %s551_s10 = sshll.u32 %s200_s9, 3  ;;  %s552_s11 = sshll.u32 %s913_s23, 3 }
  0x1c   : > { %s1283_s1 = sld [smem:[#allocation22_spill]]  ;;  %s202_s27 = scalar_lea.vmem [#allocation7], %s551_s10 }
  0x1d   : > { %s210_s21 = sshll.u32 %s202_s27, 4  ;;  %p580_p9 = pnand %p586_p8, %p1039_p6  ;;  %s211_s21 = int_to_ptr.vmem [resolvable:$true] %s210_s21 }
  0x1e   : > { %p558_p10 = scmp.ge.s32.totalorder %s921_s25, 1  ;;  %p247_p11 = scmp.lt.s32.totalorder %s921_s25, 5 }
  0x1f   : > { %s1065_s9 = scalar_lea.sflag [#allocation8], %s198_s8  ;;  %s38_s27 = sadd.s32 1, %s901_s20 }
  0x20   : > { %p1068_p12 = pnand %p558_p10, %p247_p11  ;;  %p45_p13 = scmp.ne.s32.totalorder %s901_s20, %s897_s19 }
  0x21   : > { %p51_p3 = scmp.ne.s32.totalorder %s897_s19, %s893_s18  ;;  %s179_s10 = sand.u32 1, %s901_s20  }
  0x22   : > { %s206_s26 = scalar_lea.hbm %s1283_s1, %s552_s11  ;;  %p1086_p5 = por %p46_p1, %p45_p13 }
  0x23   : > { %s208_s30 = sshll.u32 %s206_s26, 4  ;;  %s1073_s26 = sadd.s32 1, %s917_s24  ;;  %s209_s30 = int_to_ptr.hbm [resolvable:$true] %s208_s30 }
  0x24   : > { %582 = dma.hbm_to_vmem [thread:$0]  (!%p580_p9), %s209_s30, 128, %s211_s21, %s1065_s9  }
  0x25   : > { %s32_s5 = scalar_select %p1016_p0, %s1073_s26, %s917_s24 }
  0x26   : > { %p1092_p6 = por %p1023_p2, %p51_p3  ;;  %s89_s28 = ssub.s32 0, %s1073_s26 }
  0x27   : > { %p33_p4 = scmp.ge.s32.totalorder %s32_s5, 2  ;;  %s549_s23 = sshll.u32 %s179_s10, 3 }
  0x28   : > { %s1286_s21 = scalar_select %p1092_p6, 1, 0 }
  0x29   : > { %s1318_s5 = smov (%p33_p4, %s32_s5), 0  ;;  %s550_s17 = sshll.u32 %s917_s24, 3 }
  0x2a   : > { %1287 = sst [smem:[#allocation21_spill]] %s1286_s21  ;;  %s35_s18 = ssub.s32 %s917_s24, %s1318_s5 }
  0x2b   : > { %s100_s15 = sadd.s32 1, %s1318_s5  ;;  %p36_p0 = scmp.eq.s32.totalorder %s35_s18, 0 }
  0x2c   : > { %s102_s4 = ssub.s32 0, %s100_s15  ;;  %s183_s3 = scalar_lea.vmem [#allocation5], %s549_s23 }
  0x2d   : > { %s1104_s30 = scalar_select %p36_p0, %s901_s20, %s38_s27  }
  0x2e   : > { %s544_s1 = smin.u32 %s102_s4, %s100_s15  ;;  %s191_s22 = sshll.u32 %s183_s3, 4  ;;  %s192_s22 = int_to_ptr.vmem [resolvable:$true] %s191_s22 }
  0x2f   : > { %s104_s7 = sand.u32 1, %s544_s1   ;;  %s187_s21 = scalar_lea.hbm %s1255_s0, %s550_s17 }
  0x30   : > { %s189_s18 = sshll.u32 %s187_s21, 4  ;;  %p577_p9 = pnand %p586_p8, %p1086_p5  ;;  %s190_s18 = int_to_ptr.hbm [resolvable:$true] %s189_s18 }
  0x31   : > { %s180_s27 = scalar_lea.sflag [#allocation6], %s179_s10  ;;  %s541_s1 = smin.u32 %s89_s28, %s1073_s26 }
  0x32   : > { %579 = dma.hbm_to_vmem [thread:$0]  (!%p577_p9), %s190_s18, 128, %s192_s22, %s180_s27  }
  0x33   : > { %s91_s23 = sand.u32 1, %s541_s1   ;;  %s116_s3 = sadd.s32 1, %s877_s14 }
  0x34   : > { %p123_p10 = scmp.ne.s32.totalorder %s877_s14, %s873_s13  ;;  %p543_p11 = scmp.lt.s32.totalorder %s91_s23, 0 }
  0x35   : > { %s98_s16 = sadd.s32 2, %s91_s23  ;;  %p546_p13 = scmp.lt.s32.totalorder %s104_s7, 0 }
  0x36   : > { %s111_s17 = sadd.s32 2, %s104_s7  ;;  %s1320_s16 = smov (!%p543_p11, %s98_s16), %s91_s23 }
  0x37   : > { %s1322_s17 = smov (!%p546_p13, %s111_s17), %s104_s7  ;;  %p1120_p3 = por %p123_p10, %p46_p1 }
  0x38   : > { %p129_p4 = scmp.ne.s32.totalorder %s873_s13, %s869_s12  ;;  %s113_s22 = ssub.s32 %s1320_s16, %s1322_s17 }
  0x39   : > { %s219_s26 = sand.u32 1, %s877_s14   ;;  %p114_p5 = scmp.eq.s32.totalorder %s113_s22, 0 }
  0x3a   : > { %p1129_p0 = por %p129_p4, %p1023_p2  ;;  %s553_s21 = sshll.u32 %s219_s26, 3 }
  0x3b   : > { %s557_s28 = sshll.u32 %s1320_s16, 3  ;;  %s221_s27 = scalar_lea.vmem [#allocation9], %s553_s21 }
  0x3c   : > { %s1134_s10 = scalar_select %p114_p5, %s877_s14, %s116_s3  }
  0x3d   : > { %s238_s4 = scalar_lea.hbm %s1257_s2, %s557_s28  ;;  %s242_s1 = sshll.u32 %s221_s27, 4  ;;  %s243_s1 = int_to_ptr.vmem [resolvable:$true] %s242_s1 }
  0x3e   : > { %s240_s18 = sshll.u32 %s238_s4, 4  ;;  %p1143_p1 = pnand %p586_p8, %p1120_p3  ;;  %s241_s18 = int_to_ptr.hbm [resolvable:$true] %s240_s18 }
  0x3f   : > { %s769_s29 = sshra.s32 %s241_s18, 4  ;;  %s776_s17 = scalar_lea.hbm %s1257_s2, 16  ;;  %s770_s29 = int_to_ptr.hbm [resolvable:$true] %s769_s29 }
  0x40   : > { %s771_s23 = scalar_lea.hbm %s770_s29, 8  ;;  %p773_p9 = pneg %p1143_p1 }
  0x41   : > { %p772_p2 = scmp.ne.s32.totalorder %s770_s29, %s771_s23  ;;  %p777_p8 = scmp.lt.s32.totalorder %s770_s29, %s1257_s2 }
  0x42   : > { %p778_p13 = scmp.lt.s32.totalorder %s776_s17, %s771_s23 }
  0x43   : > { %p774_p10 = pnand %p773_p9, %p772_p2 }
  0x44   : > { %p779_p3 = por %p778_p13, %p777_p8 }
  0x45   : > { %p775_p11 = pneg %p774_p10 }
  0x47   : > { %p780_p4 = pnand %p779_p3, %p775_p11 }
  0x49   : > { %783 = shalt.err (!%p780_p4)
}
  0x4a   : > { %585 = dma.hbm_to_vmem [thread:$0]  (!%p1143_p1), %s241_s18, 128, %s243_s1, %s1065_s9  }
  0x4b   : > { %251 = sbr.rel (%p1068_p12) target bundleno = 748 (0x2ec), region = 32  ;;  %s253_s21 = sand.u32 (!%p1068_p12), 1, %s897_s19  }
  0x4c   : > { %s1161_s28 = sshll.u32 (!%p1068_p12), %s253_s21, 3  ;;  %s254_s7 = scalar_lea.sflag (!%p1068_p12), [#allocation6], %s253_s21 }
  0x4d   : > { %s257_s15 = scalar_lea.vmem (!%p1068_p12), [#allocation5], %s1161_s28 }
  0x50   : > { %856 = dma.done.wait (%p1092_p6), %s254_s7, 128  }
  0x51   : > { %858 = vsyncadd (%p1092_p6), %s254_s7, 4294967168  ;;  %s1292_s4 = sadd.s32 4294967295, %s921_s25   ;;  %s1293_s27 = sld [smem:[#allocation13_spill]] }
  0x52   : > { %s263_s18 = sand.u32 1, %s1292_s4  }
  0x53   : > { %s264_s12 = scalar_lea.sflag [#allocation8], %s263_s18 }
  0x57   : > { %s265_s11 = sand.u32 1, %s1293_s27  }
  0x58   : > { %s560_s1 = sshll.u32 %s265_s11, 3 }
  0x59   : > { %s267_s29 = scalar_lea.vmem [#allocation7], %s560_s1 }
  0x5a   : > { %860 = dma.done.wait (%p1045_p7), %s264_s12, 128  }
  0x5b   : > { %862 = vsyncadd (%p1045_p7), %s264_s12, 4294967168  ;;  %s275_s23 = sand.u32 1, %s873_s13  }
  0x5c   : > { %s1176_s3 = sshll.u32 %s275_s23, 3 }
  0x5d   : > { %s277_s16 = scalar_lea.vmem [#allocation9], %s1176_s3 }
  0x5e   : > { %864 = dma.done.wait (%p1129_p0), %s264_s12, 128  }
  0x5f   : > { %866 = vsyncadd (%p1129_p0), %s264_s12, 4294967168  ;;  %s1295_s17 = sld [smem:[#allocation16_spill]] }
  0x60   : > { %s1296_s21 = sld [smem:[#allocation23_spill]] }
  0x61   : > { %s1297_s7 = sld [smem:[#allocation15_spill]] }
  0x65   : > { %p323_p12 = scmp.lt.s32.totalorder %s1295_s17, 1 }
  0x67   : > { %s1324_s17 = smov (!%p323_p12, %s1295_s17), 1  ;;  %p563_p7 = scmp.ne.s32.totalorder %s1297_s7, 0 }
  0x68   : > { %s562_s22 = sshll.u32 %s1324_s17, 3 }
  0x69   : > { %s1188_s28 = scalar_lea.vmem %s1296_s21, %s562_s22  ;;  %330 = sbr.rel (%p563_p7) target bundleno = 113 (0x71), region = 48 }
  0x6e   : > { %vm331_vm0 = vcmask 7168   ;;  %v923_v0 = vmov -1e+30   ;;  %v924_v1 = vmov 0.0  }
  0x6f   : > { %332 = vst.msk [vmem:[#allocation2] sm:$0xff] %vm331_vm0, %v923_v0 }
  0x70   : > { %333 = vst.msk [vmem:[#allocation3] sm:$0xff] %vm331_vm0, %v924_v1 }
  0x71 PF: > { %v336_v2 = vld [vmem:[%s267_s29] sm:$0xff]  ;;  %vm337_vm1 = vcmask 261120   ;;  %v334_v3 = vld [vmem:[%s257_s15] sm:$0xff]  ;;  %vm364_vm2 = vcmask 64512   ;;  %s1298_s8 = sld [smem:[#allocation15_spill]] }
  0x72   : > { %564 = vmatpush.xpose.msk.msra.mxu0 %vm337_vm1, %v336_v2  ;;  %v335_v4 = vmul.f32 2.0, %v334_v3  ;;  %s1299_s4 = sld [smem:[#allocation16_spill]] }
  0x75   : > { %565 = vmatmul.msk.f32.vlgmr.msra.gmra.mxu0 %vm337_vm1, %v335_v4 }
  0x78   : > { %p566_p6 = scmp.ne.s32.totalorder %s1299_s4, %s1298_s8 }
  0xef   : > { %369 = sbr.rel (%p566_p6) target bundleno = 253 (0xfd), region = 52 }
  0xf2   : > { %v361_v5 = vpop.f32.mrf.mxu0 }
  0xf3   : > { %365 = vst.msk [vmem:[#allocation4] sm:$0xff] %vm364_vm2, %v361_v5 }
  0xf4   : > { %v370_v6 = vlaneseq }
  0xf6   : > { %v371_v7 = vshrl.u32 %v370_v6, 7  ;;  %v373_v8 = vand.u32 127, %v370_v6 }
  0xf8   : > { %vm374_vm3 = vcmp.eq.s32.totalorder %v371_v7, %v373_v8 }
  0xfa   : > { %v375_v9 = vld [vmem:[#allocation4] sm:$0xff] }
  0xfb   : > { %v376_v10 = vsel %vm374_vm3, -1e+30, %v375_v9 }
  0xfc   : > { %377 = vst.msk [vmem:[#allocation4] sm:$0xff] %vm364_vm2, %v376_v10 }
  0xfd PF: > { %v925_v13 = vmov 0   ;;  %v379_v14 = vld [vmem:[#allocation2] sm:$0xff]  ;;  %vm401_vm4 = vcmask 7168   ;;  %v395_v25 = vld [vmem:[#allocation3] sm:$0xff]  ;;  %s1300_s15 = sld [smem:[#allocation15_spill]] }
  0xfe   : > { %702 = vset.pattern.permute.xlu0 %v925_v13 }
 0x103   : > { %v378_v11 = vld [vmem:[#allocation4] sm:$0xff]  ;;  %p567_p5 = scmp.ne.s32.totalorder %s1300_s15, 1 }
 0x104   : > { %v380_v12 = vsel %vm364_vm2, %v378_v11, -inf }
 0x105   : > { %381 = vmax.xlane.f32.xlu0 %v380_v12 }
 0x178   : > { %v382_v15 = vpop.xlane.xlu0 %381 }
 0x179   : > { %v383_v16 = vmax.f32 %v379_v14, %v382_v15 }
 0x17b   : > { %v384_v17 = vsub.f32 %v379_v14, %v383_v16  ;;  %403 = vst.msk [vmem:[#allocation2] sm:$0xff] %vm401_vm4, %v383_v16  ;;  %389 = vperm.xlu0 %702, %v383_v16  }
 0x17d   : > { %v385_v23 = vmul.f32 1.442695, %v384_v17 }
 0x1ed   : > { %v390_v18 = vpop.permute.xlu0 %389 }
 0x1ee   : > { %v392_v19 = vsub.f32 %v378_v11, %v390_v18 }
 0x1f0   : > { %v393_v20 = vmul.f32 1.442695, %v392_v19 }
 0x1f2   : > { %703 = vpow2.f32 %v393_v20 }
 0x1f3   : > { %705 = vpow2.f32 %v385_v23 }
 0x1f8   : > { %v704_v21 = vpop.eup %703 }
 0x1f9   : > { %v397_v22 = vsel %vm364_vm2, %v704_v21, 0.0  ;;  %v706_v24 = vpop.eup %705 }
 0x1fa   : > { %398 = vadd.xlane.f32.xlu1 %v397_v22  ;;  %v396_v26 = vmul.f32 %v706_v24, %v395_v25 }
 0x26c   : > { %407 = sbr.rel (%p567_p5) target bundleno = 748 (0x2ec), region = 56 }
 0x26d   : > { %v399_v27 = vpop.xlane.xlu1 %398 }
 0x26e   : > { %v400_v28 = vadd.f32 %v399_v27, %v396_v26 }
 0x270   : > { %402 = vst.msk [vmem:[#allocation3] sm:$0xff] %vm401_vm4, %v400_v28 }
 0x271   : > { %v413_v29 = vld [vmem:[%s277_s16] sm:$0xff] }
 0x272   : > { %v414_v30 = vmul.f32 %v413_v29, %v335_v4  ;;  %v408_v35 = vld [vmem:[#allocation2] sm:$0xff] }
 0x274   : > { %v415_v31 = vsel %vm337_vm1, %v414_v30, 0.0 }
 0x275   : > { %416 = vadd.xlane.f32.xlu0 %v415_v31 }
 0x277   : > { %v409_v32 = vld [vmem:[#allocation3] sm:$0xff] }
 0x278   : > { %707 = vlog2.f32 %v409_v32 }
 0x27e   : > { %v708_v33 = vpop.eup %707 }
 0x27f   : > { %v411_v34 = vmul.f32 0.6931472, %v708_v33 }
 0x281   : > { %v412_v36 = vadd.f32 %v411_v34, %v408_v35 }
 0x2e8   : > { %v417_v37 = vpop.xlane.xlu0 %416 }
 0x2e9   : > { %v418_v38 = vsub.f32 %v412_v36, %v417_v37 }
 0x2eb   : > { %419 = vst.msk [vmem:[%s1188_s28] sm:$0xff] %vm401_vm4, %v418_v38 }
 0x2ec PF: > { %s19_s25 = sadd.s32 1, %s921_s25   ;;  %s1302_s15 = sld [smem:[#allocation13_spill]] }
 0x2ed   : > { %p1208_p0 = scmp.ge.s32.totalorder %s19_s25, 6   ;;  %s1303_s16 = sld [smem:[#allocation14_spill]] }
 0x2ee   : > { %s1304_s17 = sld [smem:[#allocation20_spill]]  ;;  %s1307_s12 = smov %s873_s13 }
 0x2ef   : > { %s1305_s21 = sld [smem:[#allocation17_spill]]  ;;  %s1308_s13 = smov %s877_s14 }
 0x2f0   : > { %s1306_s23 = sld [smem:[#allocation18_spill]]  ;;  %s1309_s14 = smov %s1134_s10 }
 0x2f1   : > { %s1310_s18 = smov %s897_s19  ;;  %s1311_s19 = smov %s901_s20 }
 0x2f2   : > { %s1312_s20 = smov %s1104_s30  ;;  %s1313_s22 = smov %s917_s24 }
 0x2f3   : > { %s1314_s24 = smov %s1318_s5  ;;  %18 = sbr.rel (!%p1208_p0) target bundleno = 13 (0xd), region = 108 }
 0x2f8   :  { %439 = vsyncpa [#allocation6], 1 }
 0x2f9   :  { %441 = vsyncpa [#allocation6 + $0x1], 1 }
 0x2fa   :  { %442 = vsyncpa [#allocation8], 1 }
 0x2fb   :  { %444 = vsyncpa [#allocation8 + $0x1], 1 }

</bundles_post_ra>
